<compile_context>
chip_gen: v7x
topology: tpu7x:2x2x1
jax: 0.10.0
libtpu: 0.0.40
codegen_flags: <defaults>
</compile_context>

<pallas_src>
import jax
import jax.numpy as jnp
import numpy as np
from jax.experimental import pallas as pl
from jax.experimental.pallas import tpu as pltpu


def _phase_row_kernel(x_ref, r_ref, o_ref):
    """One (batch, output phase-row pi) per grid step.

    x_ref: (1, H+2, (W+2)*Cin)          zero-padded original-res input, W*Cin folded on lanes
    r_ref: (1, 3, (W+2)*Cin, 2*W*Cout)  banded effective weights for this phase row
    o_ref: (1, 1, H, 2*W*Cout)          output slab: column = pj*(W*Cout) + w*Cout + c
    """
    H = o_ref.shape[2]
    x = x_ref[0]                                            # (H+2, (W+2)*Cin)
    # Register accumulation over the 3 vertical taps; single lane-dense store.
    acc = jnp.dot(x[0:H, :], r_ref[0, 0], preferred_element_type=jnp.float32)
    acc += jnp.dot(x[1:H + 1, :], r_ref[0, 1], preferred_element_type=jnp.float32)
    acc += jnp.dot(x[2:H + 2, :], r_ref[0, 2], preferred_element_type=jnp.float32)
    o_ref[0, 0] = jnp.maximum(acc, 0.0).astype(o_ref.dtype)


def _effective_phase_weights(weight_oihw, W):
    """Fold (nearest-x2 upsample -> 3x3 conv) into per-phase-row banded matmul weights.

    Returns R of shape (2, 3, (W+2)*Cin, 2*W*Cout) with
      R[pi, dh, n*Cin+ci, pj*W*Cout + b*Cout + co] = sum of the original 3x3 taps (kh, kw)
      that read padded-input pixel (row a+dh, col b+dw==n) when producing output (2a+pi, 2b+pj).
    """
    Cout, Cin, _, _ = weight_oihw.shape
    w = jnp.transpose(weight_oihw, (2, 3, 1, 0)).astype(jnp.float32)   # OIHW -> HWIO
    # sel[p, d, k] = 1 iff original tap k lands on padded-input offset d for output phase p
    # (per spatial axis): offset(p, k) = 1 + floor((p + k - 1) / 2).
    sel = jnp.array([[[1, 0, 0], [0, 1, 1], [0, 0, 0]],
                     [[0, 0, 0], [1, 1, 0], [0, 0, 1]]], dtype=jnp.float32)
    # weff[pi, pj, dh, dw, ci, co]
    weff = jnp.einsum('pak,qbl,klio->pqabio', sel, sel, w)
    # band[dw, n, b] = 1 iff padded column n == output column b + dw
    n_idx = jnp.arange(W + 2)
    b_idx = jnp.arange(W)
    dw_idx = jnp.arange(3)
    band = (n_idx[None, :, None] ==
            (b_idx[None, None, :] + dw_idx[:, None, None])).astype(jnp.float32)
    # r7[pi, dh, n, ci, pj, b, co]
    r7 = jnp.einsum('dnb,pqhdio->phniqbo', band, weff)
    return r7.reshape(2, 3, (W + 2) * Cin, 2 * W * Cout)


def decoder_block_forward(x_nchw, weight_oihw):
    """DecoderBlock forward: nearest upsample (x2) -> conv3x3 (pad=1, no bias) -> ReLU.

    x_nchw:      (B, Cin, H, W)
    weight_oihw: (Cout, Cin, 3, 3)   (PyTorch Conv2d weight layout)
    returns:     (B, Cout, 2H, 2W)
    """
    B, Cin, H, W = x_nchw.shape
    Cout = weight_oihw.shape[0]

    # Layout plumbing only (no upsampled tensor in HBM): NCHW -> NHWC, pad=1, fold W*Cin.
    x = jnp.transpose(x_nchw, (0, 2, 3, 1)).astype(jnp.float32)
    x_pad = jnp.pad(x, ((0, 0), (1, 1), (1, 1), (0, 0)))
    x_flat = x_pad.reshape(B, H + 2, (W + 2) * Cin)

    r = _effective_phase_weights(weight_oihw, W)            # (2, 3, (W+2)*Cin, 2*W*Cout)
    n_lanes = 2 * W * Cout

    out_k = pl.pallas_call(
        _phase_row_kernel,
        out_shape=jax.ShapeDtypeStruct((B, 2, H, n_lanes), jnp.float32),
        grid_spec=pltpu.PrefetchScalarGridSpec(
            num_scalar_prefetch=0,
            grid=(B, 2),                                     # (batch, output phase-row)
            in_specs=[
                # same input block for both phase rows -> stays resident across the pi axis
                pl.BlockSpec((1, H + 2, (W + 2) * Cin), lambda b, i: (b, 0, 0)),
                pl.BlockSpec((1, 3, (W + 2) * Cin, n_lanes), lambda b, i: (i, 0, 0, 0)),
            ],
            out_specs=pl.BlockSpec((1, 1, H, n_lanes), lambda b, i: (b, i, 0, 0)),
        ),
        compiler_params=pltpu.CompilerParams(
            dimension_semantics=("parallel", "parallel")),
    )(x_flat, r)

    # Interleave the phase slabs: (b, pi, a, pj, b_, c) -> (B, 2H, 2W, Cout) -> NCHW.
    y = out_k.reshape(B, 2, H, 2, W, Cout)
    y = jnp.transpose(y, (0, 2, 1, 4, 3, 5)).reshape(B, 2 * H, 2 * W, Cout)
    return jnp.transpose(y, (0, 3, 1, 2))


def reference_forward(x_nchw, weight_oihw):
    """Pure-JAX reference (same semantics as the PyTorch module)."""
    x = jnp.transpose(x_nchw, (0, 2, 3, 1))
    x = jnp.repeat(jnp.repeat(x, 2, axis=1), 2, axis=2)      # nearest upsample x2
    w = jnp.transpose(weight_oihw, (2, 3, 1, 0))
    y = jax.lax.conv_general_dilated(
        x, w, window_strides=(1, 1), padding="SAME",
        dimension_numbers=("NHWC", "HWIO", "NHWC"))
    y = jnp.maximum(y, 0.0)
    return jnp.transpose(y, (0, 3, 1, 2))


if __name__ == "__main__":
    key = jax.random.PRNGKey(0)
    kx, kw = jax.random.split(key)

    B, Cin, Cout, H, W = 2, 4, 8, 16, 16
    x = jax.random.normal(kx, (B, Cin, H, W), dtype=jnp.float32)
    # deterministic conv weights (no checkpoint load); shape matches nn.Conv2d(Cin, Cout, 3)
    weight = jax.random.normal(kw, (Cout, Cin, 3, 3), dtype=jnp.float32) * 0.1

    out = decoder_block_forward(x, weight)
    out = jax.block_until_ready(out)

    ref = reference_forward(x, weight)
    assert out.shape == (B, Cout, 2 * H, 2 * W), out.shape
    np.testing.assert_allclose(np.asarray(out), np.asarray(ref), rtol=1e-5, atol=1e-5)

    print("KERNEL_OK")
</pallas_src>

<mosaic_0001>
module attributes {stable_mosaic.version = 11 : i64} {
  func.func @_phase_row_kernel(%arg0: i32, %arg1: i32, %arg2: memref<1x18x72xf32, #tpu.memory_space<vmem>>, %arg3: memref<1x3x72x256xf32, #tpu.memory_space<vmem>>, %arg4: memref<1x1x16x256xf32, #tpu.memory_space<vmem>>) attributes {dimension_semantics = [#tpu.dimension_semantics<parallel>, #tpu.dimension_semantics<parallel>], iteration_bounds = array<i64: 2, 2>, scalar_prefetch = 0 : i64, scratch_operands = 0 : i64, tpu.core_type = #tpu.core_type<tc>, window_params = [{transform_indices = @transform_0, window_bounds = array<i64: 1, 18, 72>}, {transform_indices = @transform_1, window_bounds = array<i64: 1, 3, 72, 256>}, {transform_indices = @transform_2, window_bounds = array<i64: 1, 1, 16, 256>}]} {
    %c0 = arith.constant 0 : index
    %c0_0 = arith.constant 0 : index
    %c0_1 = arith.constant 0 : index
    %0 = vector.load %arg2[%c0, %c0_0, %c0_1] : memref<1x18x72xf32, #tpu.memory_space<vmem>>, vector<1x18x72xf32>
    %1 = vector.shape_cast %0 : vector<1x18x72xf32> to vector<18x72xf32>
    %2 = vector.extract_strided_slice %1 {offsets = [0, 0], sizes = [16, 72], strides = [1, 1]} : vector<18x72xf32> to vector<16x72xf32>
    %c0_2 = arith.constant 0 : index
    %c0_3 = arith.constant 0 : index
    %c0_4 = arith.constant 0 : index
    %c0_5 = arith.constant 0 : index
    %3 = vector.load %arg3[%c0_2, %c0_3, %c0_4, %c0_5] : memref<1x3x72x256xf32, #tpu.memory_space<vmem>>, vector<1x1x72x256xf32>
    %4 = vector.shape_cast %3 : vector<1x1x72x256xf32> to vector<72x256xf32>
    %cst = arith.constant dense<0.000000e+00> : vector<16x256xf32>
    %5 = tpu.matmul %2, %4, %cst {dimension_numbers = #tpu.dot_dimension_numbers<[1], [0], [0], [1], [0, 0, 1, 1], [], []>} : vector<16x72xf32>, vector<72x256xf32>, vector<16x256xf32> -> vector<16x256xf32>
    %6 = vector.extract_strided_slice %1 {offsets = [1, 0], sizes = [16, 72], strides = [1, 1]} : vector<18x72xf32> to vector<16x72xf32>
    %c0_6 = arith.constant 0 : index
    %c1 = arith.constant 1 : index
    %c0_7 = arith.constant 0 : index
    %c0_8 = arith.constant 0 : index
    %7 = vector.load %arg3[%c0_6, %c1, %c0_7, %c0_8] : memref<1x3x72x256xf32, #tpu.memory_space<vmem>>, vector<1x1x72x256xf32>
    %8 = vector.shape_cast %7 : vector<1x1x72x256xf32> to vector<72x256xf32>
    %cst_9 = arith.constant dense<0.000000e+00> : vector<16x256xf32>
    %9 = tpu.matmul %6, %8, %cst_9 {dimension_numbers = #tpu.dot_dimension_numbers<[1], [0], [0], [1], [0, 0, 1, 1], [], []>} : vector<16x72xf32>, vector<72x256xf32>, vector<16x256xf32> -> vector<16x256xf32>
    %10 = arith.addf %5, %9 : vector<16x256xf32>
    %11 = vector.extract_strided_slice %1 {offsets = [2, 0], sizes = [16, 72], strides = [1, 1]} : vector<18x72xf32> to vector<16x72xf32>
    %c0_10 = arith.constant 0 : index
    %c2 = arith.constant 2 : index
    %c0_11 = arith.constant 0 : index
    %c0_12 = arith.constant 0 : index
    %12 = vector.load %arg3[%c0_10, %c2, %c0_11, %c0_12] : memref<1x3x72x256xf32, #tpu.memory_space<vmem>>, vector<1x1x72x256xf32>
    %13 = vector.shape_cast %12 : vector<1x1x72x256xf32> to vector<72x256xf32>
    %cst_13 = arith.constant dense<0.000000e+00> : vector<16x256xf32>
    %14 = tpu.matmul %11, %13, %cst_13 {dimension_numbers = #tpu.dot_dimension_numbers<[1], [0], [0], [1], [0, 0, 1, 1], [], []>} : vector<16x72xf32>, vector<72x256xf32>, vector<16x256xf32> -> vector<16x256xf32>
    %15 = arith.addf %10, %14 : vector<16x256xf32>
    %cst_14 = arith.constant 0.000000e+00 : f32
    %16 = vector.broadcast %cst_14 : f32 to vector<16x256xf32>
    %17 = arith.maximumf %15, %16 : vector<16x256xf32>
    %c0_15 = arith.constant 0 : index
    %c0_16 = arith.constant 0 : index
    %c0_17 = arith.constant 0 : index
    %c0_18 = arith.constant 0 : index
    %18 = vector.load %arg4[%c0_15, %c0_16, %c0_17, %c0_18] : memref<1x1x16x256xf32, #tpu.memory_space<vmem>>, vector<1x1x16x256xf32>
    %19 = vector.shape_cast %18 : vector<1x1x16x256xf32> to vector<16x256xf32>
    %20 = vector.shape_cast %17 : vector<16x256xf32> to vector<1x1x16x256xf32>
    tpu.vector_store %arg4[%c0_15, %c0_16, %c0_17, %c0_18], %20 {strides = array<i32>} : memref<1x1x16x256xf32, #tpu.memory_space<vmem>>, vector<1x1x16x256xf32>,
    return
  }
  func.func @transform_0(%arg0: i32, %arg1: i32) -> (i32, i32, i32) {
    %c0_i32 = arith.constant 0 : i32
    %c0_i32_0 = arith.constant 0 : i32
    %c0_i32_1 = arith.constant 0 : i32
    return %arg0, %c0_i32, %c0_i32_0 : i32, i32, i32
  }
  func.func @transform_1(%arg0: i32, %arg1: i32) -> (i32, i32, i32, i32) {
    %c0_i32 = arith.constant 0 : i32
    %c0_i32_0 = arith.constant 0 : i32
    %c0_i32_1 = arith.constant 0 : i32
    %c0_i32_2 = arith.constant 0 : i32
    return %arg1, %c0_i32, %c0_i32_0, %c0_i32_1 : i32, i32, i32, i32
  }
  func.func @transform_2(%arg0: i32, %arg1: i32) -> (i32, i32, i32, i32) {
    %c0_i32 = arith.constant 0 : i32
    %c0_i32_0 = arith.constant 0 : i32
    %c0_i32_1 = arith.constant 0 : i32
    return %arg0, %arg1, %c0_i32, %c0_i32_0 : i32, i32, i32, i32
  }
}

</mosaic_0001>

<bundles_post_ra>
// kernel: tpu_custom_call.1
= control target key start
LH: loop header
LB: loop body
LE: loop exit
PB: predicated region body
PF: predicated region fallthrough
CT: control target
= control target key end

     0   :  { %7 = vsyncpa [#allocation3], 0  ;;  %s1360_s0 = inlined_call_operand.vmem [shape: f32[2,18,72], index: 0, kind: input, shape index: {}]   ;;  %s1361_s1 = inlined_call_operand.hbm [shape: f32[2,3,72,256], index: 1, kind: input, shape index: {}]   ;;  %s1362_s2 = inlined_call_operand.hbm [shape: f32[2,2,16,256], index: 2, kind: output, shape index: {}]  }
   0x1   :  { %9 = vsyncpa [#allocation3 + $0x1], 0 }
   0x2   :  { %10 = vsyncpa [#allocation4], 0 }
   0x3   :  { %12 = vsyncpa [#allocation4 + $0x1], 0  ;;  %s1050_s9 = smov 0   ;;  %s1052_s10 = smov 0  }
   0x4   :  { %s1054_s11 = smov 0   ;;  %s1056_s12 = smov 0  }
   0x5   :  { %s1058_s13 = smov 0   ;;  %s1060_s14 = smov 0  }
   0x6   :  { %s1062_s15 = smov 0   ;;  %s1064_s16 = smov 0  }
   0x7   :  { %s1066_s17 = smov 0   ;;  %s1068_s18 = smov 0  }
   0x8   :  { %s1070_s19 = smov 0  }
   0x9 LB: > { %s641_s20 = sadd.s32 4294967295, %s1026_s19   ;;  %s642_s21 = sadd.s32 4294967294, %s1026_s19   ;;  %s1026_s19 = sphi %s1070_s19, %s18_s19   ;;  %s1022_s18 = sphi %s1068_s18, %s1384_s18   ;;  %s1018_s17 = sphi %s1066_s17, %s1383_s17   ;;  %s1014_s16 = sphi %s1064_s16, %s1382_s16   ;;  %s1010_s15 = sphi %s1062_s15, %s1381_s15   ;;  %s1006_s14 = sphi %s1060_s14, %s1380_s14   ;;  %s1002_s13 = sphi %s1058_s13, %s1379_s13   ;;  %s998_s12 = sphi %s1056_s12, %s1378_s12   ;;  %s994_s11 = sphi %s1054_s11, %s1377_s11   ;;  %s990_s10 = sphi %s1052_s10, %s1376_s10   ;;  %s986_s9 = sphi %s1050_s9, %s1375_s9  }
   0xa   : > { %s27_s22 = sadd.s32 1, %s1018_s17  ;;  %s30_s23 = sadd.s32 1, %s1022_s18 }
   0xb   : > { %p28_p0 = scmp.ge.s32.totalorder %s27_s22, 2  ;;  %s63_s24 = sadd.s32 1, %s1006_s14 }
   0xc   : > { %p70_p1 = scmp.ne.s32.totalorder %s1006_s14, %s1002_s13  ;;  %p71_p2 = scmp.eq.s32.totalorder %s1026_s19, 0 }
   0xd   : > { %s1386_s22 = smov (%p28_p0, %s27_s22), 0  ;;  %s1388_s23 = smov (!%p28_p0, %s30_s23), %s1022_s18 }
   0xe   : > { %s60_s25 = ssub.s32 %s1018_s17, %s1386_s22  ;;  %p1116_p3 = por %p71_p2, %p70_p1 }
   0xf   : > { %p32_p4 = scmp.ge.s32.totalorder %s1388_s23, 2  ;;  %p61_p5 = scmp.eq.s32.totalorder %s60_s25, 0 }
  0x10   : > { %p76_p6 = scmp.ne.s32.totalorder %s1002_s13, %s998_s12  ;;  %p77_p7 = scmp.eq.s32.totalorder %s641_s20, 0 }
  0x11   : > { %s1390_s23 = smov (%p32_p4, %s1388_s23), 0  ;;  %s91_s3 = sadd.s32 1, %s994_s11 }
  0x12   : > { %1366 = sst [smem:[#allocation8_spill]] %s1390_s23  ;;  %p1126_p8 = por %p77_p7, %p76_p6 }
  0x13   : > { %s1124_s27 = scalar_select %p61_p5, %s1006_s14, %s63_s24  }
  0x14   : > { %s86_s29 = ssub.s32 %s1022_s18, %s1390_s23  ;;  %p101_p10 = scmp.ne.s32.totalorder %s994_s11, %s990_s10 }
  0x15   : > { %s88_s30 = sor.u32 %s86_s29, %s60_s25  ;;  %p102_p11 = scmp.eq.s32.totalorder %s641_s20, 3 }
  0x16   : > { %p89_p9 = scmp.eq.s32.totalorder %s88_s30, 0  ;;  %p107_p12 = scmp.ne.s32.totalorder %s990_s10, %s986_s9 }
  0x17   : > { %p1140_p13 = por %p102_p11, %p101_p10  ;;  %p108_p0 = scmp.eq.s32.totalorder %s642_s21, 3 }
  0x18   : > { %s1138_s4 = scalar_select %p89_p9, %s994_s11, %s91_s3  }
  0x19   : > { %s1368_s5 = scalar_select %p1140_p13, 1, 0 }
  0x1a   : > { %p779_p1 = scmp.lt.s32.totalorder %s1026_s19, 4  ;;  %p1145_p2 = por %p108_p0, %p107_p12 }
  0x1b   : > { %s136_s7 = sand.u32 1, %s1006_s14   ;;  %s764_s12 = smul.u32 6912, %s1018_s17 }
  0x1c   : > { %s1369_s6 = scalar_select %p1145_p2, 1, 0 }
  0x1d   : > { %s763_s8 = smul.u32 432, %s136_s7  ;;  %p1153_p4 = pnand %p779_p1, %p1116_p3 }
  0x1e   : > { %s1160_s29 = scalar_lea.hbm %s1361_s1, %s764_s12  ;;  %s1165_s26 = scalar_lea.sflag [#allocation3], %s136_s7 }
  0x1f   : > { %s140_s21 = scalar_lea.vmem [#allocation2], %s763_s8  ;;  %s874_s3 = scalar_lea.hbm %s1160_s29, 6912 }
  0x20   : > { %s147_s30 = sshll.u32 %s140_s21, 4  ;;  %p875_p3 = scmp.ne.s32.totalorder %s1160_s29, %s874_s3  ;;  %s1162_s30 = int_to_ptr.vmem [resolvable:$true] %s147_s30 }
  0x21   : > { %p876_p6 = pneg %p1153_p4  ;;  %s879_s25 = scalar_lea.hbm %s1361_s1, 13824 }
  0x22   : > { %p880_p10 = scmp.lt.u32.totalorder %s1160_s29, %s1361_s1  ;;  %p881_p11 = scmp.lt.u32.totalorder %s879_s25, %s874_s3 }
  0x23   : > { %p877_p7 = pnand %p876_p6, %p875_p3  ;;  %p883_p0 = scmp.lt.u32.totalorder %s874_s3, %s1160_s29 }
  0x24   : > { %p882_p12 = por %p881_p11, %p880_p10 }
  0x25   : > { %p878_p9 = pneg %p877_p7 }
  0x26   : > { %p884_p1 = por %p883_p0, %p882_p12 }
  0x28   : > { %p885_p5 = pnand %p884_p1, %p878_p9 }
  0x2a   : > { %888 = shalt.err (!%p885_p5)
}
  0x2b   : > { %s889_s7 = scalar_lea.vmem %s1162_s30, 6912  ;;  %s1028_s21 = smov [#allocation2]  }
  0x2c   : > { %p890_p3 = scmp.ne.s32.totalorder %s1162_s30, %s889_s7  ;;  %s894_s12 = sshll.u32 %s1028_s21, 4  ;;  %s895_s12 = int_to_ptr.vmem [resolvable:$false] %s894_s12 }
  0x2d   : > { %s896_s23 = scalar_lea.vmem %s895_s12, 13824  ;;  %p897_p13 = scmp.lt.s32.totalorder %s1162_s30, %s895_s12 }
  0x2e   : > { %p892_p7 = pnand %p890_p3, %p876_p6  ;;  %p898_p10 = scmp.lt.s32.totalorder %s896_s23, %s889_s7 }
  0x30   : > { %p893_p2 = pneg %p892_p7  ;;  %p899_p11 = por %p898_p10, %p897_p13 }
  0x32   : > { %p900_p12 = pnand %p899_p11, %p893_p2 }
  0x34   : > { %903 = shalt.err (!%p900_p12)
}
  0x35   : > { %s1029_s3 = smov 256   ;;  %s1030_s20 = smov 16  }
  0x36   : > { %774 = dma.hbm_to_vmem [thread:$0]  (!%p1153_p4), %s1160_s29, 6912, %s1162_s30, %s1165_s26, %s1029_s3, %s1029_s3, %s1030_s20  }
  0x37   : > { %p155_p5 = scmp.lt.s32.totalorder %s1026_s19, 5  ;;  %p1371_p6 = scmp.ge.s32.totalorder %s1026_s19, 1 }
  0x39   : > { %p156_p9 = pnand %p1371_p6, %p155_p5 }
  0x3a   : > { %s161_s25 = sand.u32 (!%p156_p9), 1, %s1002_s13  }
  0x3b   : > { %159 = sbr.rel (%p156_p9) target bundleno = 341 (0x155), region = 28  ;;  %s162_s7 = scalar_lea.sflag (!%p156_p9), [#allocation3], %s161_s25 }
  0x3c   : > { %s765_s8 = smul.u32 (!%p156_p9), 432, %s161_s25 }
  0x3e   : > { %s1197_s21 = scalar_lea.vmem (!%p156_p9), [#allocation2], %s765_s8 }
  0x42   : > { %977 = dma.done.wait (%p1126_p8), %s162_s7, 6912  }
  0x43   : > { %979 = vsyncadd (%p1126_p8), %s162_s7, 4294960384  ;;  %v1031_v0 = vmov 0.0   ;;  %p191_p13 = scmp.lt.s32.totalorder %s1014_s16, 1  ;;  %v650_v1 = vld [vmem:[%s1197_s21 + $0x98] sm:$0xff]  ;;  %v652_v2 = vld [vmem:[%s1197_s21 + $0xa8] sm:$0xff]  ;;  %vm239_vm0 = vcmask 1046528  }
  0x44   : > { %314 = vmatprep.mubr.f32.mxu1 %v1031_v0  ;;  %395 = vmatprep.mubr.f32.mxu0 %v1031_v0  ;;  %v200_v3 = vld [vmem:[%s1197_s21 + $0x8] sm:$0xff]  ;;  %v697_v4 = vpack.c.bf16 %v652_v2, %v650_v1  ;;  %v202_v5 = vld [vmem:[%s1197_s21 + $0x18] sm:$0xff]  ;;  %v649_v6 = vld [vmem:[%s1197_s21 + $0x90] sm:$0xff]  ;;  %vm245_vm1 = vcmask 588800   ;;  %vm427_vm2 = vcmask 1045504   ;;  %s188_s12 = sand.u32 1, %s990_s10  }
  0x45   : > { %v651_v7 = vld [vmem:[%s1197_s21 + $0xa0] sm:$0xff]  ;;  %s1213_s28 = scalar_select %p191_p13, %s1014_s16, 1  ;;  %v713_v8 = vpack.c.bf16 %v202_v5, %v200_v3  ;;  %v201_v11 = vld [vmem:[%s1197_s21 + $0x10] sm:$0xff]  ;;  %v654_v12 = vld [vmem:[%s1197_s21 + $0xb8] sm:$0xff] }
  0x46   : > { %v699_v9 = vpack.c.bf16 %v651_v7, %v649_v6  ;;  %v199_v10 = vld [vmem:[%s1197_s21] sm:$0xff]  ;;  %698 = vmatprep.subr.bf16.mxu1 %v697_v4  ;;  %v656_v14 = vld [vmem:[%s1197_s21 + $0xc8] sm:$0xff]  ;;  %v206_v16 = vld [vmem:[%s1197_s21 + $0x38] sm:$0xff]  ;;  %s647_s23 = sshll.u32 %s188_s12, 5  ;;  %s692_s3 = sshll.u32 %s1010_s15, 2 }
  0x47   : > { %v715_v13 = vpack.c.bf16 %v201_v11, %v199_v10  ;;  %v204_v15 = vld [vmem:[%s1197_s21 + $0x28] sm:$0xff]  ;;  %714 = vmatprep.subr.bf16.mxu0 %v713_v8  ;;  %v701_v17 = vpack.c.bf16 %v656_v14, %v654_v12  ;;  %v653_v19 = vld [vmem:[%s1197_s21 + $0xb0] sm:$0xff]  ;;  %v655_v20 = vld [vmem:[%s1197_s21 + $0xc0] sm:$0xff]  ;;  %s766_s24 = smul.u32 24, %s1213_s28  ;;  %s693_s20 = sshll.u32 %s1014_s16, 3 }
  0x48   : > { %700 = vmatpush1.bf16.msra.mxu1 %v699_v9  ;;  %v717_v18 = vpack.c.bf16 %v206_v16, %v204_v15  ;;  %v203_v21 = vld [vmem:[%s1197_s21 + $0x20] sm:$0xff]  ;;  %v703_v22 = vpack.c.bf16 %v655_v20, %v653_v19  ;;  %v205_v23 = vld [vmem:[%s1197_s21 + $0x30] sm:$0xff]  ;;  %v658_v24 = vld [vmem:[%s1197_s21 + $0xd8] sm:$0xff]  ;;  %s539_s25 = sadd.s32 %s693_s20, %s692_s3  ;;  %s190_s8 = scalar_lea.vmem [#allocation5], %s647_s23 }
  0x49   : > { %716 = vmatpush1.bf16.msra.mxu0 %v715_v13  ;;  %v660_v25 = vld [vmem:[%s1197_s21 + $0xe8] sm:$0xff]  ;;  %702 = vmatprep.subr.bf16.mxu1 %v701_v17  ;;  %v719_v26 = vpack.c.bf16 %v205_v23, %v203_v21  ;;  %v210_v29 = vld [vmem:[%s1197_s21 + $0x58] sm:$0xff]  ;;  %v657_v30 = vld [vmem:[%s1197_s21 + $0xd0] sm:$0xff]  ;;  %s195_s26 = scalar_lea.vmem %s1360_s0, %s766_s24  ;;  %s542_s7 = sshll.u32 %s190_s8, 4  ;;  %s1292_s7 = int_to_ptr.vmem [resolvable:$true] %s542_s7 }
  0x4a   : > { %718 = vmatprep.subr.bf16.mxu0 %v717_v18  ;;  %v705_v27 = vpack.c.bf16 %v660_v25, %v658_v24  ;;  %v208_v28 = vld [vmem:[%s1197_s21 + $0x48] sm:$0xff]  ;;  %v659_v32 = vld [vmem:[%s1197_s21 + $0xe0] sm:$0xff]  ;;  %v209_v34 = vld [vmem:[%s1197_s21 + $0x50] sm:$0xff]  ;;  %s1299_s24 = scalar_lea.sflag [#allocation4], %s188_s12  ;;  %s904_s29 = scalar_lea.vmem %s1292_s7, 512 }
  0x4b   : > { %v721_v31 = vpack.c.bf16 %v210_v29, %v208_v28  ;;  %v207_v33 = vld [vmem:[%s1197_s21 + $0x40] sm:$0xff]  ;;  %v707_v35 = vpack.c.bf16 %v659_v32, %v657_v30  ;;  %v662_v36 = vld [vmem:[%s1197_s21 + $0xf8] sm:$0xff]  ;;  %v664_v37 = vld [vmem:[%s1197_s21 + $0x108] sm:$0xff]  ;;  %p905_p8 = scmp.ne.s32.totalorder %s1292_s7, %s904_s29  ;;  %p1372_p2 = scmp.ne.s32.totalorder %s1368_s5, 0 }
  0x4c   : > { %704 = vmatpush1.bf16.msra.mxu1 %v703_v22  ;;  %v212_v38 = vld [vmem:[%s1197_s21 + $0x68] sm:$0xff]  ;;  %v723_v39 = vpack.c.bf16 %v209_v34, %v207_v33  ;;  %v709_v40 = vpack.c.bf16 %v664_v37, %v662_v36  ;;  %v214_v41 = vld [vmem:[%s1197_s21 + $0x78] sm:$0xff]  ;;  %v661_v42 = vld [vmem:[%s1197_s21 + $0xf0] sm:$0xff]  ;;  %s1032_s30 = smov [#allocation5]  }
  0x4d   : > { %720 = vmatpush1.bf16.msra.mxu0 %v719_v26  ;;  %706 = vmatprep.subr.bf16.mxu1 %v705_v27  ;;  %v663_v43 = vld [vmem:[%s1197_s21 + $0x100] sm:$0xff]  ;;  %v725_v44 = vpack.c.bf16 %v214_v41, %v212_v38  ;;  %v213_v46 = vld [vmem:[%s1197_s21 + $0x70] sm:$0xff]  ;;  %v1247_v49 = vld [vmem:[%s195_s26 + $0x8] sm:$0xff]  ;;  %p906_p4 = pnand %p905_p8, %p1372_p2 }
  0x4e   : > { %722 = vmatprep.subr.bf16.mxu0 %v721_v31  ;;  %v211_v45 = vld [vmem:[%s1197_s21 + $0x60] sm:$0xff]  ;;  %v711_v47 = vpack.c.bf16 %v663_v43, %v661_v42  ;;  %v666_v51 = vld [vmem:[%s1197_s21 + $0x118] sm:$0xff]  ;;  %v241_v53 = vrot.slane %v1247_v49, 1  ;;  %v216_v54 = vld [vmem:[%s1197_s21 + $0x88] sm:$0xff]  ;;  %v429_v22 = vrot.slane %v1247_v49, 2 }
  0x4f   : > { %v1245_v48 = vld [vmem:[%s195_s26] sm:$0xff]  ;;  %v727_v50 = vpack.c.bf16 %v213_v46, %v211_v45  ;;  %v672_v55 = vld [vmem:[%s1197_s21 + $0x128] sm:$0xff]  ;;  %v674_v56 = vld [vmem:[%s1197_s21 + $0x138] sm:$0xff]  ;;  %p907_p0 = pneg %p906_p4 }
  0x50   : > { %708 = vmatpush1.bf16.msra.mxu1 %v707_v35  ;;  %v240_v52 = vrot.slane %v1245_v48, 1  ;;  %v665_v57 = vld [vmem:[%s1197_s21 + $0x110] sm:$0xff]  ;;  %v671_v58 = vld [vmem:[%s1197_s21 + $0x120] sm:$0xff]  ;;  %v676_v60 = vld [vmem:[%s1197_s21 + $0x148] sm:$0xff]  ;;  %v729_v2 = vpack.c.bf16 %v674_v56, %v672_v55  ;;  %v428_v25 = vrot.slane %v1245_v48, 2 }
  0x51   : > { %724 = vmatpush1.bf16.msra.mxu0 %v723_v39  ;;  %710 = vmatprep.subr.bf16.mxu1 %v709_v40  ;;  %v673_v59 = vld [vmem:[%s1197_s21 + $0x130] sm:$0xff]  ;;  %v678_v61 = vld [vmem:[%s1197_s21 + $0x158] sm:$0xff]  ;;  %v215_v63 = vld [vmem:[%s1197_s21 + $0x80] sm:$0xff] }
  0x52   : > { %726 = vmatprep.subr.bf16.mxu0 %v725_v44  ;;  %v198_v62 = vld [vmem:[%s195_s26 + $0x10] sm:$0x3]  ;;  %v242_v1 = vsel %vm239_vm0, %v240_v52, %v241_v53  ;;  %v731_v3 = vpack.c.bf16 %v673_v59, %v671_v58  ;;  %v733_v5 = vpack.c.bf16 %v678_v61, %v676_v60  ;;  %v680_v8 = vld [vmem:[%s1197_s21 + $0x168] sm:$0xff]  ;;  %v682_v9 = vld [vmem:[%s1197_s21 + $0x178] sm:$0xff]  ;;  %s908_s26 = sshll.u32 %s1032_s30, 4  ;;  %s909_s26 = int_to_ptr.vmem [resolvable:$false] %s908_s26 }
  0x53   : > { %v243_v4 = vrot.slane %v198_v62, 1  ;;  %v675_v6 = vld [vmem:[%s1197_s21 + $0x140] sm:$0xff]  ;;  %v677_v7 = vld [vmem:[%s1197_s21 + $0x150] sm:$0xff]  ;;  %v737_v12 = vpack.c.bf16 %v682_v9, %v680_v8  ;;  %v684_v15 = vld [vmem:[%s1197_s21 + $0x188] sm:$0xff]  ;;  %v431_v23 = vrot.slane %v198_v62, 2  ;;  %s910_s23 = scalar_lea.vmem %s909_s26, 1024  ;;  %p911_p1 = scmp.lt.s32.totalorder %s1292_s7, %s909_s26 }
  0x54   : > { %712 = vmatpush1.bf16.msra.mxu1 %v711_v47  ;;  %v735_v10 = vpack.c.bf16 %v677_v7, %v675_v6  ;;  %v679_v13 = vld [vmem:[%s1197_s21 + $0x160] sm:$0xff]  ;;  %v681_v14 = vld [vmem:[%s1197_s21 + $0x170] sm:$0xff]  ;;  %v686_v16 = vld [vmem:[%s1197_s21 + $0x198] sm:$0xff]  ;;  %p912_p3 = scmp.lt.s32.totalorder %s910_s23, %s904_s29 }
  0x55   : > { %728 = vmatpush1.bf16.msra.mxu0 %v727_v50  ;;  %266 = vmatprep.subr.mxu1 %v666_v51  ;;  %v244_v11 = vsel %vm239_vm0, %v241_v53, %v243_v4  ;;  %v739_v17 = vpack.c.bf16 %v681_v14, %v679_v13  ;;  %v741_v18 = vpack.c.bf16 %v686_v16, %v684_v15  ;;  %v683_v19 = vld [vmem:[%s1197_s21 + $0x180] sm:$0xff]  ;;  %v685_v20 = vld [vmem:[%s1197_s21 + $0x190] sm:$0xff]  ;;  %v688_v24 = vld [vmem:[%s1197_s21 + $0x1a8] sm:$0xff] }
  0x56   : > { %347 = vmatprep.subr.mxu0 %v216_v54  ;;  %v743_v21 = vpack.c.bf16 %v685_v20, %v683_v19  ;;  %v687_v26 = vld [vmem:[%s1197_s21 + $0x1a0] sm:$0xff]  ;;  %v432_v27 = vsel %vm427_vm2, %v429_v22, %v431_v23  ;;  %s694_s21 = sshll.u32 %s539_s25, 7  ;;  %p913_p7 = por %p912_p3, %p911_p1 }
  0x57   : > { %s1297_s28 = scalar_lea.hbm %s1362_s2, %s694_s21 }
  0x58   : > { %267 = vmatpush1.msra.mxu1 %v665_v57  ;;  %p914_p10 = pnand %p913_p7, %p907_p0 }
  0x59   : > { %348 = vmatpush1.msra.mxu0 %v215_v63  ;;  %667 = vmatmul.mubr.msk.f32.vlgmr.msra.gmra.mrb[0].mxu1 %vm245_vm1, %v242_v1 }
  0x5a   : > { %730 = vmatprep.subr.bf16.mxu0 %v729_v2  ;;  %745 = vmatprep.subr.bf16.mxu1 %v729_v2 }
  0x5b   : > { %669 = vmatmul.mubr.msk.f32.vlgmr.msra.gmra.mrb[0].mxu0 %vm245_vm1, %v1245_v48  ;;  %750 = vmatpush1.bf16.msra.mxu1 %v731_v3 }
  0x5c   : > { %732 = vmatpush1.bf16.msra.mxu0 %v731_v3  ;;  %746 = vmatprep.subr.bf16.mxu1 %v733_v5 }
  0x5d   : > { %734 = vmatprep.subr.bf16.mxu0 %v733_v5  ;;  %320 = vmatprep.mubr.f32.mxu1 %v1031_v0 }
  0x5e   : > { %401 = vmatprep.mubr.f32.mxu0 %v1031_v0  ;;  %668 = vmatmul.mubr.msk.f32.gmra.mrb[2].mxu1 %vm245_vm1, %v244_v11 }
  0x5f   : > { %751 = vmatpush1.bf16.msra.mxu1 %v735_v10  ;;  %670 = vmatmul.mubr.msk.f32.gmra.mrb[2].mxu0 %vm245_vm1, %v1247_v49 }
  0x60   : > { %736 = vmatpush1.bf16.msra.mxu0 %v735_v10  ;;  %747 = vmatprep.subr.bf16.mxu1 %v737_v12 }
  0x61   : > { %738 = vmatprep.subr.bf16.mxu0 %v737_v12  ;;  %501 = vmatprep.mubr.f32.mxu0 %v1031_v0 }
  0x62   : > { %507 = vmatprep.mubr.f32.mxu1 %v1031_v0  ;;  %v430_v0 = vsel %vm427_vm2, %v428_v25, %v429_v22 }
  0x63   : > { %752 = vmatpush1.bf16.msra.mxu1 %v739_v17 }
  0x64   : > { %740 = vmatpush1.bf16.msra.mxu0 %v739_v17  ;;  %748 = vmatprep.subr.bf16.mxu1 %v741_v18 }
  0x65   : > { %742 = vmatprep.subr.bf16.mxu0 %v741_v18 }
  0x67   : > { %753 = vmatpush1.bf16.msra.mxu1 %v743_v21 }
  0x68   : > { %744 = vmatpush1.bf16.msra.mxu0 %v743_v21  ;;  %749 = vmatprep.subr.mxu1 %v688_v24 }
  0x69   : > { %453 = vmatprep.subr.mxu0 %v688_v24 }
  0x6b   : > { %754 = vmatpush1.msra.mxu1 %v687_v26 }
  0x6c   : > { %454 = vmatpush1.msra.mxu0 %v687_v26  ;;  %690 = vmatmul.mubr.msk.f32.vlgmr.msra.gmra.mrb[4].mxu1 %vm245_vm1, %v432_v27 }
  0x6d   : > { %689 = vmatmul.mubr.msk.f32.vlgmr.msra.gmra.mrb[0].mxu0 %vm245_vm1, %v430_v0 }
 0x12c   : > { %v316_v28 = vpop.f32.mrb[0].mxu1 }
 0x12d   : > { %v318_v29 = vpop.f32.mrb[1].mxu1 }
 0x131   : > { %v322_v30 = vpop.f32.mrb[2].mxu1 }
 0x132   : > { %v403_v31 = vpop.f32.mrb[2].mxu0  ;;  %v324_v32 = vpop.f32.mrb[3].mxu1 }
 0x133   : > { %v404_v33 = vadd.f32 %v403_v31, %v322_v30  ;;  %v405_v34 = vpop.f32.mrb[3].mxu0 }
 0x134   : > { %v406_v35 = vadd.f32 %v405_v34, %v324_v32 }
 0x13f   : > { %v509_v36 = vpop.f32.mrb[4].mxu1 }
 0x140   : > { %v503_v37 = vpop.f32.mrb[0].mxu0  ;;  %v516_v38 = vadd.f32 %v509_v36, %v404_v33  ;;  %v511_v39 = vpop.f32.mrb[5].mxu1 }
 0x141   : > { %v755_v40 = vadd.f32 %v503_v37, %v316_v28  ;;  %v505_v41 = vpop.f32.mrb[1].mxu0  ;;  %v517_v42 = vadd.f32 %v511_v39, %v406_v35 }
 0x142   : > { %v520_v43 = vmax.f32 %v516_v38, 0.0  ;;  %v756_v44 = vadd.f32 %v505_v41, %v318_v29 }
 0x143   : > { %v518_v45 = vmax.f32 %v755_v40, 0.0  ;;  %v521_v46 = vmax.f32 %v517_v42, 0.0 }
 0x144   : > { %524 = vst [vmem:[%s190_s8 + $0x10] sm:$0xff] %v520_v43  ;;  %v519_v47 = vmax.f32 %v756_v44, 0.0 }
 0x145   : > { %522 = vst [vmem:[%s190_s8] sm:$0xff] %v518_v45  ;;  %525 = vst [vmem:[%s190_s8 + $0x18] sm:$0xff] %v521_v46 }
 0x146   : > { %523 = vst [vmem:[%s190_s8 + $0x8] sm:$0xff] %v519_v47 }
 0x147   : > { %917 = shalt.err (!%p914_p10)
}
 0x148   : > { %s918_s12 = scalar_lea.hbm %s1297_s28, 512  ;;  %s922_s25 = scalar_lea.hbm %s1362_s2, 2048 }
 0x149   : > { %p919_p11 = scmp.ne.s32.totalorder %s1297_s28, %s918_s12  ;;  %p923_p6 = scmp.lt.u32.totalorder %s1297_s28, %s1362_s2 }
 0x14a   : > { %p924_p9 = scmp.lt.u32.totalorder %s922_s25, %s918_s12  ;;  %p926_p8 = scmp.lt.u32.totalorder %s918_s12, %s1297_s28 }
 0x14b   : > { %p920_p12 = pnand %p919_p11, %p1372_p2 }
 0x14c   : > { %p925_p13 = por %p924_p9, %p923_p6 }
 0x14d   : > { %p921_p5 = pneg %p920_p12 }
 0x14e   : > { %p927_p4 = por %p926_p8, %p925_p13 }
 0x150   : > { %p928_p0 = pnand %p927_p4, %p921_p5 }
 0x152   : > { %931 = shalt.err (!%p928_p0)
}
 0x153   : > { %s1033_s15 = smov 256   ;;  %s1034_s16 = smov 16  }
 0x154   : > { %769 = dma.vmem_to_hbm [thread:$0]  (%p1372_p2), %s1292_s7, 512, %s1297_s28, %s1299_s24, %s1033_s15, %s1033_s15, %s1034_s16  }
 0x155 PF: > { %p780_p1 = scmp.ge.s32.totalorder %s1026_s19, 2  ;;  %s557_s29 = sand.u32 1, %s986_s9  }
 0x156   : > { %p1373_p3 = scmp.ne.s32.totalorder %s1369_s6, 0  ;;  %s558_s30 = scalar_lea.sflag [#allocation4], %s557_s29 }
 0x158   : > { %p776_p7 = pnand %p780_p1, %p1373_p3 }
 0x15a   : > { %981 = dma.done.wait (!%p776_p7), %s558_s30, 512  }
 0x15b   : > { %983 = vsyncadd (!%p776_p7), %s558_s30, 4294966784  ;;  %s18_s19 = sadd.s32 1, %s1026_s19   ;;  %s1374_s5 = sld [smem:[#allocation8_spill]] }
 0x15c   : > { %p15_p10 = scmp.ge.s32.totalorder %s18_s19, 6   ;;  %s1375_s9 = smov %s990_s10 }
 0x15d   : > { %s1376_s10 = smov %s994_s11  ;;  %s1377_s11 = smov %s1138_s4 }
 0x15e   : > { %s1378_s12 = smov %s1002_s13  ;;  %s1379_s13 = smov %s1006_s14 }
 0x15f   : > { %s1380_s14 = smov %s1124_s27  ;;  %s1381_s15 = smov %s1018_s17 }
 0x160   : > { %s1382_s16 = smov %s1022_s18  ;;  %s1383_s17 = smov %s1386_s22 }
 0x161   : > { %s1384_s18 = smov %s1374_s5  ;;  %17 = sbr.rel (!%p15_p10) target bundleno = 9 (0x9), region = 78 }
 0x168   :  { %563 = vsyncpa [#allocation3], 1 }
 0x169   :  { %565 = vsyncpa [#allocation3 + $0x1], 1 }
 0x16a   :  { %566 = vsyncpa [#allocation4], 1 }
 0x16b   :  { %568 = vsyncpa [#allocation4 + $0x1], 1 }

</bundles_post_ra>
